<compile_context>
chip_gen: v7x
topology: tpu7x:2x2x1
jax: 0.10.0
libtpu: 0.0.40
codegen_flags: <defaults>
</compile_context>

<pallas_src>
import functools

import jax
import jax.numpy as jnp
from jax.experimental import pallas as pl
from jax.experimental.pallas import tpu as pltpu


# ----------------------------------------------------------------------------
# Block sizing / VMEM budgeting helpers (review items 1, 2, 3, 4)
# ----------------------------------------------------------------------------
def _pick_block_b(B, N, row_elems, itemsize, target_bytes=2 << 20):
    """Batch rows per block so the per-block slab is ~target_bytes."""
    bytes_per_batch_row = max(1, N * row_elems * itemsize)
    block_b = max(1, min(B, target_bytes // bytes_per_batch_row))
    # v7x has 2 TensorCores/chip: prefer >= 2 batch blocks so the "parallel"
    # axis actually shards, as long as partial blocks stay sublane-aligned.
    if block_b >= B and B >= 16:
        block_b = -(-B // 2)
    if block_b < B:
        block_b = max(8, (block_b // 8) * 8)  # keep second-minor dims % 8 == 0
    return int(min(block_b, B))


def _vmem_limit(*block_bytes, headroom=4 << 20):
    """Double-buffered blocks + headroom, clamped to safe per-TC limits."""
    need = 2 * sum(int(b) for b in block_bytes) + headroom
    return int(min(64 << 20, max(need, 16 << 20)))


# ----------------------------------------------------------------------------
# Fast kernel (default): score == 1.0 exactly  =>  out[b] = sum_n v[b, n, :]
# ----------------------------------------------------------------------------
def _sum_v_kernel(v_ref, o_ref):
    # Accumulate in f32 even for bf16 v (review correctness note #1).
    o_ref[...] = jnp.sum(v_ref[...].astype(jnp.float32), axis=1).astype(o_ref.dtype)


def std_attn(q, k, v, params):
    """Bit-exact StdAttn forward: the q/k path is numerically dead (score==1)."""
    B, N, E = q.shape
    if k.shape[-1] != E or v.shape[-1] != E:
        raise ValueError("Assume identical embedding dim for q, k, v")
    # PyTorch's (B,N,A)+(N,B,A) broadcast add requires B == N.  (PyTorch would
    # also accept B==1 or N==1 via broadcast; that case is not supported here.)
    if B != N:
        raise ValueError("StdAttn requires bsz == num_queries (broadcast add)")
    del params  # numerically dead: softmax over a size-1 axis is exactly 1.0

    itemsize = jnp.dtype(v.dtype).itemsize
    block_b = _pick_block_b(B, N, E, itemsize)          # ~2 MiB v slab per step
    grid = (pl.cdiv(B, block_b),)
    v_block_bytes = block_b * N * E * itemsize
    o_block_bytes = block_b * E * itemsize

    return pl.pallas_call(
        _sum_v_kernel,
        out_shape=jax.ShapeDtypeStruct((B, E), v.dtype),
        grid=grid,
        in_specs=[pl.BlockSpec((block_b, N, E), lambda i: (i, 0, 0))],
        out_specs=pl.BlockSpec((block_b, E), lambda i: (i, 0)),
        compiler_params=pltpu.CompilerParams(
            dimension_semantics=("parallel",),
            vmem_limit_bytes=_vmem_limit(v_block_bytes, o_block_bytes),
        ),
    )(v)


# ----------------------------------------------------------------------------
# Optional faithful kernel: full q/k path, tiled + bf16 MXU (review 5/6/8/9/10)
# ----------------------------------------------------------------------------
def _full_path_kernel(q_ref, k_ref, v_ref, wq_ref, wk_ref, b_ref, ws_ref, bs_ref,
                      o_ref, *, num_queries):
    # q_ref/k_ref/v_ref : (block_b*N, E) flat 2-D views (no wrapper concat)
    # wq_ref/wk_ref     : (E, A) resident weights
    # b_ref             : (1, A) = bq + bk, added ONCE
    # ws_ref            : (1, A) Linear(A,1) weight
    # bs_ref            : (1,)   Linear(A,1) bias, in SMEM
    # o_ref             : (block_b, E)
    rows, E = v_ref.shape
    bb = rows // num_queries

    # Two bf16 MXU matmuls with f32 accumulation (native MXU dtype everywhere).
    acc = jnp.dot(q_ref[...].astype(jnp.bfloat16), wq_ref[...].astype(jnp.bfloat16),
                  preferred_element_type=jnp.float32)
    acc = acc + jnp.dot(k_ref[...].astype(jnp.bfloat16), wk_ref[...].astype(jnp.bfloat16),
                        preferred_element_type=jnp.float32)
    attn_in = acc + b_ref[...]                              # (rows, A), f32

    # Elementwise path stays f32 (v5e has no bf16 VPU/EUP).  Dropout == identity.
    h = jnp.tanh(attn_in)
    s = jnp.sum(h * ws_ref[...], axis=-1, keepdims=True) + bs_ref[0]   # (rows, 1)

    # Softmax over the size-1 last axis degenerates to exactly 1.0:
    # max == s, exp(s - max) == 1, normalizer == 1.  No max reduce, no divide;
    # pl.reciprocal(approx=True) is avoided to keep score bit-exactly 1.0.
    score = jnp.exp(s - s)                                  # (rows, 1) == 1.0

    # Weighted reduce without reshaping/broadcasting score against 3-D v:
    # lane-broadcast the column against the flat v tile, then a sublane-split
    # reshape + sublane-group reduce over the N rows of each batch element.
    weighted = score * v_ref[...].astype(jnp.float32)        # (rows, E)
    o_ref[...] = jnp.sum(weighted.reshape(bb, num_queries, E), axis=1).astype(o_ref.dtype)


def std_attn_faithful(q, k, v, params):
    """Same result, with the q/k/tanh/score path actually computed on-chip."""
    B, N, E = q.shape
    A = params["wq"].shape[1]
    if k.shape[-1] != E or v.shape[-1] != E:
        raise ValueError("Assume identical embedding dim for q, k, v")
    if B != N:
        raise ValueError("StdAttn requires bsz == num_queries (broadcast add)")

    # q.reshape(N, B, E) is a layout identity when B == N, so the flat row
    # order of attn_input matches q.reshape(B*N, E) / k.reshape(B*N, E).
    # These reshapes are metadata-only views: no HBM concat traffic (item 5).
    q2 = q.reshape(B * N, E)
    k2 = k.reshape(B * N, E)
    v2 = v.reshape(B * N, E)
    b_fused = params["bq"] + params["bk"]                   # (1, A), tiny, one-time

    itemsize = 4  # f32 activations
    block_b = _pick_block_b(B, N, 3 * E, itemsize)          # q + k + v per row
    block_rows = block_b * N
    grid = (pl.cdiv(B, block_b),)

    act_bytes = 3 * block_rows * E * itemsize
    w_bytes = (2 * E * A + 2 * A) * itemsize
    out_bytes = block_b * E * itemsize

    kernel = functools.partial(_full_path_kernel, num_queries=N)
    return pl.pallas_call(
        kernel,
        out_shape=jax.ShapeDtypeStruct((B, E), v.dtype),
        grid=grid,
        in_specs=[
            pl.BlockSpec((block_rows, E), lambda i: (i, 0)),      # q (flat)
            pl.BlockSpec((block_rows, E), lambda i: (i, 0)),      # k (flat)
            pl.BlockSpec((block_rows, E), lambda i: (i, 0)),      # v (flat)
            pl.BlockSpec((E, A), lambda i: (0, 0)),               # wq (resident)
            pl.BlockSpec((E, A), lambda i: (0, 0)),               # wk (resident)
            pl.BlockSpec((1, A), lambda i: (0, 0)),               # bq + bk
            pl.BlockSpec((1, A), lambda i: (0, 0)),               # ws
            pl.BlockSpec(memory_space=pltpu.MemorySpace.SMEM),    # bs (1,) scalar
        ],
        out_specs=pl.BlockSpec((block_b, E), lambda i: (i, 0)),
        compiler_params=pltpu.CompilerParams(
            dimension_semantics=("parallel",),
            vmem_limit_bytes=_vmem_limit(act_bytes, w_bytes, out_bytes),
        ),
    )(q2, k2, v2, params["wq"], params["wk"], b_fused, params["ws"], params["bs"])


# ----------------------------------------------------------------------------
# Params / reference
# ----------------------------------------------------------------------------
def init_params(key, input_size, att_dim):
    """Deterministic nn.Linear-style init: U(-1/sqrt(fan_in), 1/sqrt(fan_in))."""
    ks = jax.random.split(key, 6)
    lim_e = 1.0 / jnp.sqrt(jnp.float32(input_size))
    lim_a = 1.0 / jnp.sqrt(jnp.float32(att_dim))
    return {
        # stored pre-transposed: (in_features, out_features)
        "wq": jax.random.uniform(ks[0], (input_size, att_dim), jnp.float32, -lim_e, lim_e),
        "bq": jax.random.uniform(ks[1], (1, att_dim), jnp.float32, -lim_e, lim_e),
        "wk": jax.random.uniform(ks[2], (input_size, att_dim), jnp.float32, -lim_e, lim_e),
        "bk": jax.random.uniform(ks[3], (1, att_dim), jnp.float32, -lim_e, lim_e),
        # Linear(att_dim, 1): weight (1, att_dim), bias (1,)  (1-D for SMEM)
        "ws": jax.random.uniform(ks[4], (1, att_dim), jnp.float32, -lim_a, lim_a),
        "bs": jax.random.uniform(ks[5], (1,), jnp.float32, -lim_a, lim_a),
    }


def std_attn_ref(q, k, v, p):
    """Pure-JAX reference mirroring the PyTorch forward line by line."""
    B, N, E = q.shape
    A = p["wq"].shape[1]
    q_r = q.reshape(N, B, E)
    tq = q_r @ p["wq"] + p["bq"][0]
    tk = k @ p["wk"] + p["bk"][0]
    attn_in = tk + tq                                      # (B, N, A), needs B == N
    h = jnp.tanh(attn_in.reshape(-1, A))
    s = h @ p["ws"].T + p["bs"]                            # (B*N, 1)
    score = jax.nn.softmax(s, axis=-1).reshape(B, N, 1)    # == 1.0 exactly
    return jnp.sum(score * v, axis=1)


if __name__ == "__main__":
    # bsz == num_queries, as the module's (B,N,A)+(N,B,A) add requires.
    B, N, E, A = 8, 8, 32, 16
    key = jax.random.PRNGKey(0)
    kq, kk, kv, kp = jax.random.split(key, 4)

    q = jax.random.normal(kq, (B, N, E), jnp.float32)
    k = jax.random.normal(kk, (B, N, E), jnp.float32)
    v = jax.random.normal(kv, (B, N, E), jnp.float32)
    params = init_params(kp, input_size=E, att_dim=A)

    ref = std_attn_ref(q, k, v, params)

    out = jax.block_until_ready(std_attn(q, k, v, params))
    assert out.shape == (B, E)
    assert jnp.allclose(out, ref, atol=1e-5, rtol=1e-5), "fast kernel mismatch"

    out_f = jax.block_until_ready(std_attn_faithful(q, k, v, params))
    assert out_f.shape == (B, E)
    assert out_f.dtype == out.dtype
    assert jnp.allclose(out_f, ref, atol=1e-5, rtol=1e-5), "faithful kernel mismatch"

    print("KERNEL_OK")
</pallas_src>

<mosaic_0001>
module attributes {stable_mosaic.version = 11 : i64} {
  func.func @_sum_v_kernel(%arg0: i32, %arg1: memref<8x8x32xf32, #tpu.memory_space<vmem>>, %arg2: memref<8x32xf32, #tpu.memory_space<vmem>>) attributes {dimension_semantics = [#tpu.dimension_semantics<parallel>], iteration_bounds = array<i64: 1>, scalar_prefetch = 0 : i64, scratch_operands = 0 : i64, tpu.core_type = #tpu.core_type<tc>, window_params = [{transform_indices = @transform_0, window_bounds = array<i64: 8, 8, 32>}, {transform_indices = @transform_1, window_bounds = array<i64: 8, 32>}]} {
    %c0 = arith.constant 0 : index
    %c0_0 = arith.constant 0 : index
    %c0_1 = arith.constant 0 : index
    %0 = vector.load %arg1[%c0, %c0_0, %c0_1] : memref<8x8x32xf32, #tpu.memory_space<vmem>>, vector<8x8x32xf32>
    %cst = arith.constant dense<0.000000e+00> : vector<8x32xf32>
    %1 = vector.multi_reduction <add>, %0, %cst [1] : vector<8x8x32xf32> to vector<8x32xf32>
    %c0_2 = arith.constant 0 : index
    %c0_3 = arith.constant 0 : index
    %2 = vector.load %arg2[%c0_2, %c0_3] : memref<8x32xf32, #tpu.memory_space<vmem>>, vector<8x32xf32>
    tpu.vector_store %arg2[%c0_2, %c0_3], %1 {strides = array<i32>} : memref<8x32xf32, #tpu.memory_space<vmem>>, vector<8x32xf32>,
    return
  }
  func.func @transform_0(%arg0: i32) -> (i32, i32, i32) {
    %c0_i32 = arith.constant 0 : i32
    %c0_i32_0 = arith.constant 0 : i32
    %c0_i32_1 = arith.constant 0 : i32
    return %arg0, %c0_i32, %c0_i32_0 : i32, i32, i32
  }
  func.func @transform_1(%arg0: i32) -> (i32, i32) {
    %c0_i32 = arith.constant 0 : i32
    %c0_i32_0 = arith.constant 0 : i32
    return %arg0, %c0_i32 : i32, i32
  }
}

</mosaic_0001>

<bundles_post_ra>
// kernel: tpu_custom_call.1
= control target key start
LH: loop header
LB: loop body
LE: loop exit
PB: predicated region body
PF: predicated region fallthrough
CT: control target
= control target key end

     0   :  { %6 = vsyncpa [#allocation3], 0  ;;  %s229_s0 = inlined_call_operand.hbm [shape: f32[8,8,32], index: 0, kind: input, shape index: {}]   ;;  %s230_s1 = inlined_call_operand.hbm [shape: f32[8,32], index: 1, kind: output, shape index: {}]  }
   0x1   :  { %7 = vsyncpa [#allocation4], 0  ;;  %s179_s6 = smov [#allocation2]   ;;  %s131_s10 = scalar_lea.hbm %s229_s0, 1024 }
   0x2   :  { %s13_s7 = sshll.u32 %s179_s6, 4  ;;  %p132_p0 = scmp.ne.s32.totalorder %s229_s0, %s131_s10  ;;  %s14_s7 = int_to_ptr.vmem [resolvable:$true] %s13_s7 }
   0x3   :  { %p135_p1 = scmp.lt.u32.totalorder %s131_s10, %s229_s0 }
   0x5   :  { %p137_p2 = pnand %p135_p1, %p132_p0 }
   0x7   :  { %140 = shalt.err (!%p137_p2)
}
   0x8   :  { %s141_s15 = scalar_lea.vmem %s14_s7, 1024  ;;  %p146_p4 = scmp.lt.s32.totalorder %s14_s7, %s14_s7 }
   0x9   :  { %p142_p3 = scmp.ne.s32.totalorder %s14_s7, %s141_s15  ;;  %p147_p5 = scmp.lt.s32.totalorder %s141_s15, %s141_s15 }
   0xb   :  { %p148_p6 = por %p147_p5, %p146_p4 }
   0xd   :  { %p149_p7 = pnand %p148_p6, %p142_p3 }
   0xf   :  { %152 = shalt.err (!%p149_p7)
}
  0x10   :  { %s180_s16 = smov 128   ;;  %s181_s17 = smov 8  }
  0x11   :  { %19 = dma.hbm_to_vmem [thread:$0]  %s229_s0, 1024, %s14_s7, [#allocation3], %s180_s16, %s180_s16, %s181_s17  }
  0x12   :  { %175 = dma.done.wait [#allocation3], 1024  }
  0x13   :  { %176 = vsyncadd [#allocation3], 4294966272  ;;  %vm31_vm0 = vcmask 261120   ;;  %v23_v0 = vld [vmem:[#allocation2] sm:$0xff]  ;;  %v24_v1 = vld [vmem:[#allocation2 + $0x8] sm:$0xff]  ;;  %vm96_vm1 = vcmask 1041409  }
  0x14   :  { %v25_v2 = vld [vmem:[#allocation2 + $0x10] sm:$0xff]  ;;  %v26_v3 = vld [vmem:[#allocation2 + $0x18] sm:$0xff]  ;;  %v27_v4 = vld [vmem:[#allocation2 + $0x20] sm:$0xff]  ;;  %v32_v6 = vsel %vm31_vm0, %v23_v0, 0.0  ;;  %v39_v7 = vsel %vm31_vm0, %v24_v1, 0.0  ;;  %vm98_vm2 = vcmask 1042434  }
  0x15   :  { %v28_v5 = vld [vmem:[#allocation2 + $0x28] sm:$0xff]  ;;  %v46_v8 = vsel %vm31_vm0, %v25_v2, 0.0  ;;  %v29_v9 = vld [vmem:[#allocation2 + $0x30] sm:$0xff]  ;;  %v30_v10 = vld [vmem:[#allocation2 + $0x38] sm:$0xff]  ;;  %v33_v11 = vrot.slane %v32_v6, 4  ;;  %v40_v12 = vrot.slane %v39_v7, 4 }
  0x16   :  { %v47_v13 = vrot.slane %v46_v8, 4  ;;  %v53_v14 = vsel %vm31_vm0, %v26_v3, 0.0  ;;  %v60_v16 = vsel %vm31_vm0, %v27_v4, 0.0  ;;  %v67_v17 = vsel %vm31_vm0, %v28_v5, 0.0  ;;  %s182_s0 = smov [#allocation5]  }
  0x17   :  { %v54_v15 = vrot.slane %v53_v14, 4  ;;  %v74_v18 = vsel %vm31_vm0, %v29_v9, 0.0  ;;  %v34_v19 = vadd.f32 %v33_v11, %v32_v6  ;;  %v41_v20 = vadd.f32 %v40_v12, %v39_v7  ;;  %s118_s20 = sshll.u32 %s182_s0, 4  ;;  %s119_s20 = int_to_ptr.vmem [resolvable:$true] %s118_s20 }
  0x18   :  { %v48_v21 = vadd.f32 %v47_v13, %v46_v8  ;;  %v61_v22 = vrot.slane %v60_v16, 4  ;;  %v68_v24 = vrot.slane %v67_v17, 4  ;;  %v75_v25 = vrot.slane %v74_v18, 4  ;;  %s153_s21 = scalar_lea.vmem %s119_s20, 128  ;;  %p158_p9 = scmp.lt.s32.totalorder %s119_s20, %s119_s20 }
  0x19   :  { %v55_v23 = vadd.f32 %v54_v15, %v53_v14  ;;  %v81_v26 = vsel %vm31_vm0, %v30_v10, 0.0  ;;  %vm100_vm3 = vcmask 1043459   ;;  %v35_v27 = vrot.slane %v34_v19, 2  ;;  %p154_p8 = scmp.ne.s32.totalorder %s119_s20, %s153_s21  ;;  %p159_p10 = scmp.lt.s32.totalorder %s153_s21, %s153_s21 }
  0x1a   :  { %v42_v28 = vrot.slane %v41_v20, 2  ;;  %v49_v29 = vrot.slane %v48_v21, 2  ;;  %v62_v30 = vadd.f32 %v61_v22, %v60_v16  ;;  %v69_v32 = vadd.f32 %v68_v24, %v67_v17 }
  0x1b   :  { %v56_v31 = vrot.slane %v55_v23, 2  ;;  %v76_v33 = vadd.f32 %v75_v25, %v74_v18  ;;  %v82_v34 = vrot.slane %v81_v26, 4  ;;  %v36_v35 = vadd.f32 %v35_v27, %v34_v19  ;;  %p160_p11 = por %p159_p10, %p158_p9 }
  0x1c   :  { %v43_v36 = vadd.f32 %v42_v28, %v41_v20  ;;  %v50_v37 = vadd.f32 %v49_v29, %v48_v21  ;;  %v63_v38 = vrot.slane %v62_v30, 2  ;;  %v70_v40 = vrot.slane %v69_v32, 2 }
  0x1d   :  { %v57_v39 = vadd.f32 %v56_v31, %v55_v23  ;;  %v77_v41 = vrot.slane %v76_v33, 2  ;;  %v83_v42 = vadd.f32 %v82_v34, %v81_v26  ;;  %v37_v43 = vrot.slane %v36_v35, 1  ;;  %p161_p12 = pnand %p160_p11, %p154_p8 }
  0x1e   :  { %v44_v44 = vrot.slane %v43_v36, 1  ;;  %v51_v45 = vrot.slane %v50_v37, 1  ;;  %v64_v46 = vadd.f32 %v63_v38, %v62_v30  ;;  %v71_v48 = vadd.f32 %v70_v40, %v69_v32 }
  0x1f   :  { %v58_v47 = vrot.slane %v57_v39, 1  ;;  %v78_v49 = vadd.f32 %v77_v41, %v76_v33  ;;  %v84_v50 = vrot.slane %v83_v42, 2  ;;  %v38_v51 = vadd.f32 %v37_v43, %v36_v35 }
  0x20   :  { %v45_v52 = vadd.f32 %v44_v44, %v43_v36  ;;  %v52_v53 = vadd.f32 %v51_v45, %v50_v37  ;;  %v65_v54 = vrot.slane %v64_v46, 1  ;;  %v72_v56 = vrot.slane %v71_v48, 1 }
  0x21   :  { %v59_v55 = vadd.f32 %v58_v47, %v57_v39  ;;  %v79_v57 = vrot.slane %v78_v49, 1  ;;  %v85_v58 = vadd.f32 %v84_v50, %v83_v42  ;;  %vm102_vm4 = vcmask 1044484  }
  0x22   :  { %v66_v59 = vadd.f32 %v65_v54, %v64_v46  ;;  %v97_v60 = vsel %vm96_vm1, %v45_v52, %v38_v51  ;;  %vm104_vm5 = vcmask 1045509   ;;  %v73_v61 = vadd.f32 %v72_v56, %v71_v48 }
  0x23   :  { %v80_v62 = vadd.f32 %v79_v57, %v78_v49  ;;  %v86_v63 = vrot.slane %v85_v58, 1  ;;  %v99_v0 = vsel %vm98_vm2, %v52_v53, %v97_v60  ;;  %vm106_vm6 = vcmask 1046534  }
  0x24   :  { %v101_v1 = vsel %vm100_vm3, %v59_v55, %v99_v0  ;;  %vm108_vm7 = vcmask 1047559  }
  0x25   :  { %v87_v2 = vadd.f32 %v86_v63, %v85_v58  ;;  %v103_v3 = vsel %vm102_vm4, %v66_v59, %v101_v1 }
  0x26   :  { %v105_v4 = vsel %vm104_vm5, %v73_v61, %v103_v3 }
  0x27   :  { %v107_v5 = vsel %vm106_vm6, %v80_v62, %v105_v4 }
  0x28   :  { %v109_v6 = vsel %vm108_vm7, %v87_v2, %v107_v5 }
  0x29   :  { %111 = vst.msk [vmem:[#allocation5] sm:$0xff] %vm31_vm0, %v109_v6 }
  0x2a   :  { %164 = shalt.err (!%p161_p12)
}
  0x2b   :  { %s165_s24 = scalar_lea.hbm %s230_s1, 128 }
  0x2c   :  { %p166_p13 = scmp.ne.s32.totalorder %s230_s1, %s165_s24  ;;  %p169_p0 = scmp.lt.u32.totalorder %s165_s24, %s230_s1 }
  0x2e   :  { %p171_p1 = pnand %p169_p0, %p166_p13 }
  0x30   :  { %174 = shalt.err (!%p171_p1)
}
  0x31   :  { %121 = dma.vmem_to_hbm [thread:$0]  %s119_s20, 128, %s230_s1, [#allocation4]  }
  0x32   :  { %177 = dma.done.wait [#allocation4], 128  }
  0x33   :  { %178 = vsyncadd [#allocation4], 4294967168 }
  0x34   :  { %125 = vsyncpa [#allocation3], 1 }
  0x35   :  { %126 = vsyncpa [#allocation4], 1 }

</bundles_post_ra>
